<compile_context>
chip_gen: v7x
topology: tpu7x:2x2x1
jax: 0.10.0
libtpu: 0.0.40
codegen_flags: <defaults>
</compile_context>

<pallas_src>
import functools
import math

import jax
import jax.numpy as jnp
from jax.experimental import pallas as pl
from jax.experimental.pallas import tpu as pltpu


def _round_up(x: int, m: int) -> int:
    return ((x + m - 1) // m) * m


# ----------------------------------------------------------------------------
# Path 1: VMEM-resident table, one-hot MXU gather.
# ----------------------------------------------------------------------------
def _resident_table_kernel(ids_ref, emb_ref, out_ref, *, scale):
    """Gather T rows from a VMEM-resident table via a one-hot MXU matmul.

    ids_ref : VMEM (T, 1) int32    -- token ids for this chunk (sublane-major)
    emb_ref : VMEM (d_tok, d_emb)  -- full table, resident across the grid
    out_ref : VMEM (T, d_emb)
    """
    d_tok = emb_ref.shape[0]
    T = ids_ref.shape[0]
    ids = ids_ref[...]                                           # (T, 1)
    vocab = jax.lax.broadcasted_iota(jnp.int32, (T, d_tok), 1)   # (T, d_tok)
    one_hot = (vocab == ids).astype(emb_ref.dtype)               # exact 0/1
    gathered = jnp.dot(one_hot, emb_ref[...],
                       preferred_element_type=jnp.float32)       # (T, d_emb)
    # Keep the sqrt(d_emb) scale in-kernel (rides a free VPU slot).
    out_ref[...] = (gathered * scale).astype(out_ref.dtype)


def _token_embedding_resident(ids, emb_table, *, tokens_per_step, n_chunks,
                              scale):
    d_tok, d_emb = emb_table.shape
    T = tokens_per_step
    n_tok_pad = n_chunks * T
    itemsize = jnp.dtype(emb_table.dtype).itemsize
    table_bytes = d_tok * d_emb * itemsize
    # Resident table (conservatively x2 for pipeline buffering) + double-
    # buffered (T, d_emb) output tiles + slack; cap with headroom under v7x's
    # 64 MiB physical VMEM.
    vmem_limit = int(min(
        max(2 * table_bytes + 4 * T * d_emb * itemsize + (4 << 20), 16 << 20),
        48 << 20))

    kernel = functools.partial(_resident_table_kernel, scale=scale)
    return pl.pallas_call(
        kernel,
        out_shape=jax.ShapeDtypeStruct((n_tok_pad, d_emb), emb_table.dtype),
        grid=(n_chunks,),
        in_specs=[
            pl.BlockSpec((T, 1), lambda i: (i, 0)),           # ids chunk
            pl.BlockSpec((d_tok, d_emb), lambda i: (0, 0)),   # table: resident
        ],
        out_specs=pl.BlockSpec((T, d_emb), lambda i: (i, 0)),
        compiler_params=pltpu.CompilerParams(
            # Chunks are independent: "parallel" lets v7x shard across 2 TCs
            # (neutral on single-TC v5e/v6e).
            dimension_semantics=("parallel",),
            vmem_limit_bytes=vmem_limit,
        ),
    )(ids.reshape(n_tok_pad, 1), emb_table)


# ----------------------------------------------------------------------------
# Path 2: HBM row gather with manual double-buffered DMAs.
# ----------------------------------------------------------------------------
def _gather_dma_kernel(ids_ref, emb_hbm, out_ref, buf, copy_sem, *,
                       tokens_per_step, scale):
    """Manual double-buffered row gather from the HBM-resident table.

    ids_ref  : SMEM (n_tok_pad,) int32  -- scalar-prefetched token ids
    emb_hbm  : HBM  (d_tok, d_emb)      -- table (memory_space=pl.ANY)
    out_ref  : VMEM (T, d_emb)          -- current dense output tile
    buf      : VMEM (2, T, d_emb)       -- double buffer of gathered rows
    copy_sem : DMA semaphores, shape (2,) -- one shared semaphore per slot
    """
    T = tokens_per_step
    i = pl.program_id(0)
    n_steps = pl.num_programs(0)
    slot = i % 2

    def issue_chunk(chunk_idx, slot_idx):
        base = chunk_idx * T
        # Issue all T row copies back-to-back so T gathers are in flight at
        # once (512 B rows are latency-bound, not bandwidth-bound).
        for t in range(T):
            tok = ids_ref[base + t]
            pltpu.make_async_copy(
                emb_hbm.at[tok], buf.at[slot_idx, t], copy_sem.at[slot_idx]
            ).start()

    # Prime the pipeline on the first step.
    @pl.when(i == 0)
    def _prime():
        issue_chunk(0, 0)

    # Prefetch the next chunk into the other slot before waiting on this one.
    @pl.when(i + 1 < n_steps)
    def _prefetch():
        issue_chunk(i + 1, 1 - slot)

    # Wait for all T rows of the current slot (shared per-slot semaphore:
    # one wait per issued copy, same-shaped descriptors).
    for t in range(T):
        pltpu.make_async_copy(
            emb_hbm.at[0], buf.at[slot, t], copy_sem.at[slot]
        ).wait()

    # Scale in-kernel and emit one dense (T, d_emb) tile (unmasked stores).
    out_ref[...] = (buf[slot].astype(jnp.float32) * scale).astype(out_ref.dtype)


def _token_embedding_gather(ids, emb_table, *, tokens_per_step, n_chunks,
                            scale):
    d_tok, d_emb = emb_table.shape
    T = tokens_per_step
    n_tok_pad = n_chunks * T
    itemsize = jnp.dtype(emb_table.dtype).itemsize
    vmem_limit = int(min(
        max(8 * T * d_emb * itemsize + (4 << 20), 16 << 20), 48 << 20))

    kernel = functools.partial(_gather_dma_kernel, tokens_per_step=T,
                               scale=scale)
    return pl.pallas_call(
        kernel,
        out_shape=jax.ShapeDtypeStruct((n_tok_pad, d_emb), emb_table.dtype),
        grid_spec=pltpu.PrefetchScalarGridSpec(
            num_scalar_prefetch=1,                           # ids -> SMEM
            grid=(n_chunks,),
            in_specs=[pl.BlockSpec(memory_space=pl.ANY)],    # table stays in HBM
            out_specs=pl.BlockSpec((T, d_emb), lambda i, ids_smem: (i, 0)),
            scratch_shapes=[
                pltpu.VMEM((2, T, d_emb), emb_table.dtype),
                pltpu.SemaphoreType.DMA((2,)),
            ],
        ),
        compiler_params=pltpu.CompilerParams(
            # Cross-step prefetch state requires sequential iteration on one
            # core, so this axis must stay "arbitrary" (megacore-safe).
            dimension_semantics=("arbitrary",),
            vmem_limit_bytes=vmem_limit,
        ),
    )(ids, emb_table)


# ----------------------------------------------------------------------------
# Public wrapper.
# ----------------------------------------------------------------------------
def token_embedding(seq: jax.Array, emb_table: jax.Array, *,
                    chunk_tokens: int | None = None,
                    force_path: str | None = None) -> jax.Array:
    """Pallas equivalent of TokenEmbedding.forward.

    Args:
        seq:       (B, S) integer token ids.
        emb_table: (d_tok, d_emb) embedding weights.
    Returns:
        (B, S, d_emb) = emb_table[seq] * sqrt(d_emb).
    """
    B, S = seq.shape
    d_tok, d_emb = emb_table.shape
    n_tok = B * S
    scale = math.sqrt(float(d_emb))

    # `.long()` equivalent + bounds safety: an out-of-range id would drive an
    # out-of-bounds DMA / gather, so clamp at the boundary.
    ids = jnp.clip(seq.reshape(n_tok).astype(jnp.int32), 0, d_tok - 1)

    # Tokens per grid step: amortizes the ~0.35 us/step pipeline overhead and
    # produces dense (T, d_emb) output tiles instead of 1-sublane stores.
    if chunk_tokens is None:
        T = min(64, _round_up(n_tok, 8))
    else:
        T = _round_up(chunk_tokens, 8)
    T = max(8, T)
    n_tok_pad = _round_up(n_tok, T)
    n_chunks = n_tok_pad // T
    if n_tok_pad != n_tok:
        ids = jnp.concatenate([ids, jnp.zeros((n_tok_pad - n_tok,), jnp.int32)])

    # Fast path: keep the whole table resident in VMEM when it is small
    # (threshold sized conservatively for v7x's 64 MiB VMEM; the one-hot MXU
    # gather also wants a modest vocab so its FLOPs stay effectively free).
    itemsize = jnp.dtype(emb_table.dtype).itemsize
    table_bytes = d_tok * d_emb * itemsize
    use_resident = (table_bytes <= (2 << 20)) and (d_tok <= 1024)
    if force_path == "resident":
        use_resident = True
    elif force_path == "gather":
        use_resident = False

    if use_resident:
        out_flat = _token_embedding_resident(
            ids, emb_table, tokens_per_step=T, n_chunks=n_chunks, scale=scale)
    else:
        out_flat = _token_embedding_gather(
            ids, emb_table, tokens_per_step=T, n_chunks=n_chunks, scale=scale)

    return out_flat[:n_tok].reshape(B, S, d_emb)


if __name__ == "__main__":
    # Small shapes consistent with the module's forward.
    B, S = 2, 8               # batch, sequence length
    d_tok, d_emb = 16, 128    # vocab size, embedding dim

    key = jax.random.PRNGKey(0)
    k_emb, k_seq = jax.random.split(key)
    emb_table = jax.random.normal(k_emb, (d_tok, d_emb), dtype=jnp.float32)
    seq = jax.random.randint(k_seq, (B, S), 0, d_tok, dtype=jnp.int32)

    ref = jnp.take(emb_table, seq, axis=0) * math.sqrt(float(d_emb))

    # Path 1: VMEM-resident table (auto-selected for this small vocab).
    out_resident = jax.block_until_ready(token_embedding(seq, emb_table))
    assert out_resident.shape == (B, S, d_emb)
    # One-hot MXU gather: tolerance covers reduced-precision f32 matmul modes.
    assert jnp.allclose(out_resident, ref, rtol=5e-3, atol=1e-2)

    # Path 1 again with 2 chunks (multi-step resident pipeline).
    out_resident2 = jax.block_until_ready(
        token_embedding(seq, emb_table, chunk_tokens=8, force_path="resident"))
    assert jnp.allclose(out_resident2, ref, rtol=5e-3, atol=1e-2)

    # Path 2: HBM row gather with manual double-buffered DMAs
    # (chunk_tokens=8 -> 2 grid steps: prime + cross-step prefetch + wait).
    out_gather = jax.block_until_ready(
        token_embedding(seq, emb_table, chunk_tokens=8, force_path="gather"))
    assert out_gather.shape == (B, S, d_emb)
    assert jnp.allclose(out_gather, ref, rtol=1e-6, atol=1e-6)

    print("KERNEL_OK")
</pallas_src>

<mosaic_0001>
module attributes {stable_mosaic.version = 11 : i64} {
  func.func @_resident_table_kernel(%arg0: i32, %arg1: memref<16x1xi32, #tpu.memory_space<vmem>>, %arg2: memref<16x128xf32, #tpu.memory_space<vmem>>, %arg3: memref<16x128xf32, #tpu.memory_space<vmem>>) attributes {dimension_semantics = [#tpu.dimension_semantics<parallel>], iteration_bounds = array<i64: 1>, scalar_prefetch = 0 : i64, scratch_operands = 0 : i64, tpu.core_type = #tpu.core_type<tc>, window_params = [{transform_indices = @transform_0, window_bounds = array<i64: 16, 1>}, {pipeline_mode = #tpu.pipeline_mode<synchronous>, transform_indices = @transform_1, window_bounds = array<i64: 16, 128>}, {transform_indices = @transform_2, window_bounds = array<i64: 16, 128>}]} {
    %c0 = arith.constant 0 : index
    %c0_0 = arith.constant 0 : index
    %0 = vector.load %arg1[%c0, %c0_0] : memref<16x1xi32, #tpu.memory_space<vmem>>, vector<16x1xi32>
    %1 = tpu.iota {dimensions = array<i32: 1>} : vector<16x16xi32>
    %2 = vector.broadcast %0 : vector<16x1xi32> to vector<16x16xi32>
    %3 = arith.cmpi eq, %1, %2 : vector<16x16xi32>
    %4 = arith.extui %3 : vector<16x16xi1> to vector<16x16xi32>
    %5 = arith.sitofp %4 : vector<16x16xi32> to vector<16x16xf32>
    %c0_1 = arith.constant 0 : index
    %c0_2 = arith.constant 0 : index
    %6 = vector.load %arg2[%c0_1, %c0_2] : memref<16x128xf32, #tpu.memory_space<vmem>>, vector<16x128xf32>
    %cst = arith.constant dense<0.000000e+00> : vector<16x128xf32>
    %7 = tpu.matmul %5, %6, %cst {dimension_numbers = #tpu.dot_dimension_numbers<[1], [0], [0], [1], [0, 0, 1, 1], [], []>} : vector<16x16xf32>, vector<16x128xf32>, vector<16x128xf32> -> vector<16x128xf32>
    %cst_3 = arith.constant 11.3137083 : f32
    %8 = vector.broadcast %cst_3 : f32 to vector<16x128xf32>
    %9 = arith.mulf %7, %8 : vector<16x128xf32>
    %c0_4 = arith.constant 0 : index
    %c0_5 = arith.constant 0 : index
    %10 = vector.load %arg3[%c0_4, %c0_5] : memref<16x128xf32, #tpu.memory_space<vmem>>, vector<16x128xf32>
    tpu.vector_store %arg3[%c0_4, %c0_5], %9 {strides = array<i32>} : memref<16x128xf32, #tpu.memory_space<vmem>>, vector<16x128xf32>,
    return
  }
  func.func @transform_0(%arg0: i32) -> (i32, i32) {
    %c0_i32 = arith.constant 0 : i32
    %c0_i32_0 = arith.constant 0 : i32
    return %arg0, %c0_i32 : i32, i32
  }
  func.func @transform_1(%arg0: i32) -> (i32, i32) {
    %c0_i32 = arith.constant 0 : i32
    %c0_i32_0 = arith.constant 0 : i32
    %c0_i32_1 = arith.constant 0 : i32
    return %c0_i32, %c0_i32_0 : i32, i32
  }
  func.func @transform_2(%arg0: i32) -> (i32, i32) {
    %c0_i32 = arith.constant 0 : i32
    %c0_i32_0 = arith.constant 0 : i32
    return %arg0, %c0_i32 : i32, i32
  }
}

</mosaic_0001>

<bundles_post_ra>
// kernel: tpu_custom_call.1
= control target key start
LH: loop header
LB: loop body
LE: loop exit
PB: predicated region body
PF: predicated region fallthrough
CT: control target
= control target key end

     0   :  { %s225_s0 = inlined_call_operand.vmem [shape: s32[16,1], index: 0, kind: input, shape index: {}]   ;;  %s226_s1 = inlined_call_operand.vmem [shape: f32[16,128], index: 1, kind: input, shape index: {}]   ;;  %s227_s2 = inlined_call_operand.hbm [shape: f32[16,128], index: 2, kind: output, shape index: {}]  }
   0x1   :  { %v12_v0 = vld [vmem:[%s225_s0] sm:$0xff] }
   0x2   :  { %7 = vsyncpa [#allocation3], 0  ;;  %v181_v1 = vmov 0   ;;  %v28_v2 = vld [vmem:[%s226_s1] sm:$0xff]  ;;  %v29_v3 = vld [vmem:[%s226_s1 + $0x8] sm:$0xff]  ;;  %v14_v6 = vlaneseq  ;;  %vm30_vm0 = vcmask 130048  }
   0x3   :  { %156 = vset.pattern.permute.xlu0 %v181_v1  ;;  %v147_v4 = vpack.c.bf16 %v29_v3, %v28_v2  ;;  %v13_v5 = vld [vmem:[%s225_s0 + $0x8] sm:$0xff]  ;;  %v182_v9 = vmov 0.0   ;;  %s183_s1 = smov [#allocation2]  }
   0x4   :  { %17 = vperm.xlu0 %156, %v12_v0   ;;  %v15_v7 = vand.u32 127, %v14_v6  ;;  %s121_s17 = sshll.u32 %s183_s1, 4  ;;  %s122_s17 = int_to_ptr.vmem [resolvable:$true] %s121_s17 }
   0x5   :  { %148 = vmatprep.subr.bf16.mxu0 %v147_v4  ;;  %s157_s0 = scalar_lea.vmem %s122_s17, 256  ;;  %p162_p1 = scmp.lt.s32.totalorder %s122_s17, %s122_s17 }
   0x6   :  { %150 = vmatpush3.bf16.msra.mxu0 %v147_v4  ;;  %p158_p0 = scmp.ne.s32.totalorder %s122_s17, %s157_s0  ;;  %p163_p2 = scmp.lt.s32.totalorder %s157_s0, %s157_s0 }
   0x8   :  { %20 = vperm.xlu0 %156, %v13_v5   ;;  %p164_p3 = por %p163_p2, %p162_p1 }
   0xa   :  { %p165_p4 = pnand %p164_p3, %p158_p0 }
  0x83   :  { %v18_v8 = vpop.permute.xlu0 %17 }
  0x84   :  { %vm22_vm1 = vcmp.eq.s32.totalorder %v15_v7, %v18_v8 }
  0x85   :  { %v132_v10 = vsel %vm22_vm1, 1.0, %v182_v9 }
  0x86   :  { %144 = vmatprep.mubr.msk.f32.mxu0 %vm30_vm0, %v132_v10 }
  0x87   :  { %v21_v11 = vpop.permute.xlu0 %20 }
  0x88   :  { %vm23_vm2 = vcmp.eq.s32.totalorder %v15_v7, %v21_v11 }
  0x89   :  { %v133_v12 = vsel %vm23_vm2, 1.0, %v182_v9 }
  0x8a   :  { %145 = vmatmul.mubr.msk.f32.vlgmr.msra.gmra.mrb[0].mxu0 %vm30_vm0, %v133_v12 }
 0x15d   :  { %v146_v13 = vpop.f32.mrb[0].mxu0 }
 0x15e   :  { %v113_v14 = vmul.f32 11.313708, %v146_v13  ;;  %v103_v15 = vpop.f32.mrb[1].mxu0 }
 0x15f   :  { %v112_v16 = vmul.f32 11.313708, %v103_v15 }
 0x160   :  { %115 = vst [vmem:[#allocation2 + $0x8] sm:$0xff] %v113_v14 }
 0x161   :  { %114 = vst [vmem:[#allocation2] sm:$0xff] %v112_v16 }
 0x162   :  { %168 = shalt.err (!%p165_p4)
}
 0x163   :  { %s169_s20 = scalar_lea.hbm %s227_s2, 256 }
 0x164   :  { %p170_p5 = scmp.ne.s32.totalorder %s227_s2, %s169_s20  ;;  %p173_p6 = scmp.lt.u32.totalorder %s169_s20, %s227_s2 }
 0x166   :  { %p175_p7 = pnand %p173_p6, %p170_p5 }
 0x168   :  { %178 = shalt.err (!%p175_p7)
}
 0x169   :  { %s184_s25 = smov 128   ;;  %s185_s26 = smov 8  }
 0x16a   :  { %127 = dma.vmem_to_hbm [thread:$0]  %s122_s17, 256, %s227_s2, [#allocation3], %s184_s25, %s184_s25, %s185_s26  }
 0x16b   :  { %179 = dma.done.wait [#allocation3], 256  }
 0x16c   :  { %180 = vsyncadd [#allocation3], 4294967040 }
 0x16d   :  { %131 = vsyncpa [#allocation3], 1 }

</bundles_post_ra>
